<compile_context>
chip_gen: v7x
topology: tpu7x:2x2x1
jax: 0.10.0
libtpu: 0.0.40
codegen_flags: <defaults>
</compile_context>

<pallas_src>
import functools

import jax
import jax.numpy as jnp
import numpy as np
from jax import lax
from jax.experimental import pallas as pl
from jax.experimental.pallas import tpu as pltpu

N_BINS = 10
_LANES = 128
_STAT_ROWS = 8  # row 0: count, row 1: sum(accuracy), row 2: sum(confidence), rest 0

# Deterministic "parameters" from __init__ (used by the reference only).
_BIN_BOUNDARIES = np.linspace(0.0, 1.0, N_BINS + 1, dtype=np.float32)


def _round_up(x, m):
    return (x + m - 1) // m * m


def _cdiv(a, b):
    return (a + b - 1) // b


def _ece_stats_kernel(logits_ref, labels_ref, out_ref, *,
                      n_total, tile_rows, tiles_per_core):
    core = pl.program_id(0)   # size-2 "parallel" axis (both TCs on v7x)
    step = pl.program_id(1)   # "arbitrary" reduction axis over N tiles

    @pl.when(step == 0)
    def _init():
        out_ref[...] = jnp.zeros_like(out_ref)

    logits = logits_ref[...].astype(jnp.float32)          # (T, C)
    labels = labels_ref[...]                               # (T, 1) int32
    t, c = logits.shape

    # confidence = max softmax = exp(0) / sum(exp(logits - max)) = 1 / denom.
    row_max = jnp.max(logits, axis=1, keepdims=True)       # (T, 1)
    denom = jnp.sum(jnp.exp(logits - row_max), axis=1, keepdims=True)
    conf = 1.0 / denom

    # prediction = first index attaining the row max (torch argmax tie rule).
    col = lax.broadcasted_iota(jnp.int32, logits.shape, 1)
    pred = jnp.min(jnp.where(logits == row_max, col, c), axis=1, keepdims=True)
    acc = (pred == labels).astype(jnp.float32)              # (T, 1)

    # Mask rows past the true N (partial last tile / clamped overhang tile).
    # conf_safe = -1 falls in no bin and keeps padded-row garbage out of sums.
    g_tile = core * tiles_per_core + step
    row = g_tile * tile_rows + lax.broadcasted_iota(jnp.int32, (t, 1), 0)
    conf_safe = jnp.where(row < n_total, conf, jnp.float32(-1.0))

    # Bin boundaries from iota: lane b -> (b/NB, (b+1)/NB]; padded lanes have
    # lower >= 1.0 so no confidence (<= 1) can ever land there.
    lane = lax.broadcasted_iota(jnp.int32, (1, _LANES), 1).astype(jnp.float32)
    lo = lane / jnp.float32(N_BINS)
    hi = (lane + 1.0) / jnp.float32(N_BINS)

    # One lane-dense pass over all bins: (T,1) vs (1,128) -> (T,128) mask.
    in_bin = jnp.logical_and(conf_safe > lo, conf_safe <= hi).astype(jnp.float32)

    # One MXU matmul replaces the three (T,128) VPU multiply + sublane-reduce
    # chains: stats[t] = [1, acc_t, conf_t, 0,...];  stats^T @ in_bin -> (8,128).
    scol = lax.broadcasted_iota(jnp.int32, (t, _STAT_ROWS), 1)
    stats = jnp.where(scol == 0, jnp.float32(1.0),
            jnp.where(scol == 1, acc,
            jnp.where(scol == 2, conf_safe, jnp.float32(0.0))))
    partial = lax.dot_general(
        stats, in_bin,
        dimension_numbers=(((0,), (0,)), ((), ())),
        precision=lax.Precision.HIGHEST,        # keep confidence sums f32-exact
        preferred_element_type=jnp.float32)     # (8, 128)

    out_ref[...] += partial[None]


def _choose_tile_rows(n, c, input_vmem_budget):
    """Rows per tile from a VMEM budget (padded logits + lane-padded labels, x2 buffers)."""
    padded_c = max(_round_up(c, _LANES), _LANES)
    bytes_per_row = 4 * padded_c + 4 * _LANES        # f32 logits row + lane-padded i32 label
    tn = input_vmem_budget // (2 * bytes_per_row)    # 2 = double-buffered pipeline
    return max(8, min(8192, (tn // 8) * 8))


def ece_loss(logits, labels, *, tile_rows=None, input_vmem_budget=16 * 1024 * 1024):
    """Pallas ECE loss.  logits: (N, C) float32, labels: (N,) int -> (1,) float32."""
    n, c = logits.shape
    labels2d = labels.astype(jnp.int32).reshape(n, 1)

    tn = _choose_tile_rows(n, c, input_vmem_budget) if tile_rows is None else int(tile_rows)
    if tn >= n:
        tn = n                         # single full block (any N allowed)
    else:
        tn = max(8, (tn // 8) * 8)     # (8, 128) sublane constraint for tiled blocks

    n_tiles = _cdiv(n, tn)
    tiles_per_core = _cdiv(n_tiles, 2)  # leading size-2 grid axis -> both TCs on v7x

    def row_block(core, step):
        g = core * tiles_per_core + step
        return (jnp.minimum(g, n_tiles - 1), 0)   # clamp overhang; kernel masks it

    padded_c = max(_round_up(c, _LANES), _LANES)
    per_buffer = tn * (4 * padded_c + 4 * _LANES)
    # Explicit limit: above v5e's 16 MiB scoped default, well under v7x's 64 MiB.
    vmem_limit = int(max(32 * 1024 * 1024, 2 * per_buffer + 8 * 1024 * 1024))

    kernel = functools.partial(_ece_stats_kernel, n_total=n, tile_rows=tn,
                               tiles_per_core=tiles_per_core)
    partials = pl.pallas_call(
        kernel,
        out_shape=jax.ShapeDtypeStruct((2, _STAT_ROWS, _LANES), jnp.float32),
        grid_spec=pltpu.PrefetchScalarGridSpec(
            num_scalar_prefetch=0,
            grid=(2, tiles_per_core),
            in_specs=[
                pl.BlockSpec((tn, c), row_block),
                pl.BlockSpec((tn, 1), row_block),
            ],
            out_specs=pl.BlockSpec((1, _STAT_ROWS, _LANES),
                                   lambda core, step: (core, 0, 0)),
        ),
        compiler_params=pltpu.CompilerParams(
            dimension_semantics=("parallel", "arbitrary"),
            vmem_limit_bytes=vmem_limit),
    )(logits, labels2d)

    # Tiny epilogue in plain JAX: combine per-core partial stats + ECE formula.
    stats = jnp.sum(partials, axis=0)                    # (8, 128)
    cnt = stats[0, :N_BINS]
    acc_sum = stats[1, :N_BINS]
    conf_sum = stats[2, :N_BINS]
    safe = jnp.maximum(cnt, 1.0)
    prop = cnt / jnp.float32(n)
    per_bin = jnp.where(cnt > 0.0,
                        jnp.abs(conf_sum / safe - acc_sum / safe) * prop,
                        jnp.float32(0.0))
    return jnp.sum(per_bin).reshape(1)


def _ece_reference(logits, labels):
    """Plain-JAX reference mirroring the PyTorch forward."""
    softmaxes = jax.nn.softmax(logits, axis=1)
    confidences = jnp.max(softmaxes, axis=1)
    predictions = jnp.argmax(softmaxes, axis=1)
    accuracies = (predictions == labels).astype(jnp.float32)
    n = logits.shape[0]
    ece = jnp.zeros((1,), jnp.float32)
    for lo, hi in zip(_BIN_BOUNDARIES[:-1], _BIN_BOUNDARIES[1:]):
        in_bin = (confidences > lo) & (confidences <= hi)
        cnt = jnp.sum(in_bin.astype(jnp.float32))
        prop = cnt / n
        safe = jnp.maximum(cnt, 1.0)
        acc = jnp.sum(accuracies * in_bin) / safe
        conf = jnp.sum(confidences * in_bin) / safe
        ece = ece + jnp.where(cnt > 0, jnp.abs(conf - acc) * prop, 0.0)
    return ece


if __name__ == "__main__":
    key = jax.random.PRNGKey(0)
    k1, k2, k3, k4 = jax.random.split(key, 4)

    # Small case matching the module's forward: logits (N, C), labels (N,).
    N, C = 16, 8
    logits = jax.random.normal(k1, (N, C), dtype=jnp.float32)
    labels = jax.random.randint(k2, (N,), 0, C, dtype=jnp.int32)

    out = ece_loss(logits, labels)
    jax.block_until_ready(out)
    ref = _ece_reference(logits, labels)
    assert out.shape == (1,)
    np.testing.assert_allclose(np.asarray(out), np.asarray(ref),
                               rtol=1e-4, atol=1e-5)

    # Exercise the tiled path: multi-step grid, partial last tile, and the
    # clamped/masked overhang tile on the second "core" slice.
    N2, C2 = 300, 8
    logits2 = jax.random.normal(k3, (N2, C2), dtype=jnp.float32)
    labels2 = jax.random.randint(k4, (N2,), 0, C2, dtype=jnp.int32)
    out2 = ece_loss(logits2, labels2, tile_rows=128)
    jax.block_until_ready(out2)
    ref2 = _ece_reference(logits2, labels2)
    np.testing.assert_allclose(np.asarray(out2), np.asarray(ref2),
                               rtol=1e-4, atol=1e-5)

    print("KERNEL_OK")
</pallas_src>

<mosaic_0001>
module attributes {stable_mosaic.version = 11 : i64} {
  func.func @_ece_stats_kernel(%arg0: i32, %arg1: i32, %arg2: memref<16x8xf32, #tpu.memory_space<vmem>>, %arg3: memref<16x1xi32, #tpu.memory_space<vmem>>, %arg4: memref<1x8x128xf32, #tpu.memory_space<vmem>>) attributes {dimension_semantics = [#tpu.dimension_semantics<parallel>, #tpu.dimension_semantics<arbitrary>], iteration_bounds = array<i64: 2, 1>, scalar_prefetch = 0 : i64, scratch_operands = 0 : i64, tpu.core_type = #tpu.core_type<tc>, window_params = [{transform_indices = @transform_0, window_bounds = array<i64: 16, 8>}, {transform_indices = @transform_1, window_bounds = array<i64: 16, 1>}, {transform_indices = @transform_2, window_bounds = array<i64: 1, 8, 128>}]} {
    %c0_i32 = arith.constant 0 : i32
    %0 = arith.cmpi eq, %arg1, %c0_i32 : i32
    %1 = arith.extui %0 : i1 to i32
    %c0_i32_0 = arith.constant 0 : i32
    %2 = arith.cmpi ne, %1, %c0_i32_0 : i32
    scf.if %2 {
      %cst_23 = arith.constant 0.000000e+00 : f32
      %72 = vector.broadcast %cst_23 : f32 to vector<1x8x128xf32>
      %c0_24 = arith.constant 0 : index
      %c0_25 = arith.constant 0 : index
      %c0_26 = arith.constant 0 : index
      %73 = vector.load %arg4[%c0_24, %c0_25, %c0_26] : memref<1x8x128xf32, #tpu.memory_space<vmem>>, vector<1x8x128xf32>
      tpu.vector_store %arg4[%c0_24, %c0_25, %c0_26], %72 {strides = array<i32>} : memref<1x8x128xf32, #tpu.memory_space<vmem>>, vector<1x8x128xf32>,
    } else {
    }
    %c0 = arith.constant 0 : index
    %c0_1 = arith.constant 0 : index
    %3 = vector.load %arg2[%c0, %c0_1] : memref<16x8xf32, #tpu.memory_space<vmem>>, vector<16x8xf32>
    %c0_2 = arith.constant 0 : index
    %c0_3 = arith.constant 0 : index
    %4 = vector.load %arg3[%c0_2, %c0_3] : memref<16x1xi32, #tpu.memory_space<vmem>>, vector<16x1xi32>
    %cst = arith.constant dense<0xFF800000> : vector<16xf32>
    %5 = vector.multi_reduction <maximumf>, %3, %cst [1] : vector<16x8xf32> to vector<16xf32>
    %6 = vector.shape_cast %5 : vector<16xf32> to vector<16x1xf32>
    %7 = vector.broadcast %6 : vector<16x1xf32> to vector<16x8xf32>
    %8 = arith.subf %3, %7 : vector<16x8xf32>
    %9 = math.exp %8 : vector<16x8xf32>
    %cst_4 = arith.constant dense<0.000000e+00> : vector<16xf32>
    %10 = vector.multi_reduction <add>, %9, %cst_4 [1] : vector<16x8xf32> to vector<16xf32>
    %11 = vector.shape_cast %10 : vector<16xf32> to vector<16x1xf32>
    %cst_5 = arith.constant 1.000000e+00 : f32
    %12 = vector.broadcast %cst_5 : f32 to vector<16x1xf32>
    %13 = arith.divf %12, %11 : vector<16x1xf32>
    %14 = tpu.iota {dimensions = array<i32: 1>} : vector<16x8xi32>
    %15 = vector.broadcast %6 : vector<16x1xf32> to vector<16x8xf32>
    %16 = arith.cmpf oeq, %3, %15 : vector<16x8xf32>
    %c8_i32 = arith.constant 8 : i32
    %17 = vector.broadcast %c8_i32 : i32 to vector<16x8xi32>
    %18 = arith.select %16, %14, %17 : vector<16x8xi1>, vector<16x8xi32>
    %cst_6 = arith.constant dense<2147483647> : vector<16xi32>
    %19 = vector.multi_reduction <minsi>, %18, %cst_6 [1] : vector<16x8xi32> to vector<16xi32>
    %20 = vector.shape_cast %19 : vector<16xi32> to vector<16x1xi32>
    %21 = arith.cmpi eq, %20, %4 : vector<16x1xi32>
    %22 = arith.extui %21 : vector<16x1xi1> to vector<16x1xi32>
    %23 = arith.sitofp %22 : vector<16x1xi32> to vector<16x1xf32>
    %c1_i32 = arith.constant 1 : i32
    %24 = arith.muli %arg0, %c1_i32 : i32
    %25 = arith.addi %24, %arg1 : i32
    %c16_i32 = arith.constant 16 : i32
    %26 = arith.muli %25, %c16_i32 : i32
    %27 = tpu.iota {dimensions = array<i32: 0>} : vector<16x1xi32>
    %28 = vector.broadcast %26 : i32 to vector<16x1xi32>
    %29 = arith.addi %28, %27 : vector<16x1xi32>
    %c16_i32_7 = arith.constant 16 : i32
    %30 = vector.broadcast %c16_i32_7 : i32 to vector<16x1xi32>
    %31 = arith.cmpi slt, %29, %30 : vector<16x1xi32>
    %cst_8 = arith.constant -1.000000e+00 : f32
    %32 = vector.broadcast %cst_8 : f32 to vector<16x1xf32>
    %33 = arith.select %31, %13, %32 : vector<16x1xi1>, vector<16x1xf32>
    %34 = tpu.iota {dimensions = array<i32: 1>} : vector<1x128xi32>
    %35 = arith.sitofp %34 : vector<1x128xi32> to vector<1x128xf32>
    %cst_9 = arith.constant 1.000000e+01 : f32
    %36 = vector.broadcast %cst_9 : f32 to vector<1x128xf32>
    %37 = arith.divf %35, %36 : vector<1x128xf32>
    %cst_10 = arith.constant 1.000000e+00 : f32
    %38 = vector.broadcast %cst_10 : f32 to vector<1x128xf32>
    %39 = arith.addf %35, %38 : vector<1x128xf32>
    %cst_11 = arith.constant 1.000000e+01 : f32
    %40 = vector.broadcast %cst_11 : f32 to vector<1x128xf32>
    %41 = arith.divf %39, %40 : vector<1x128xf32>
    %42 = vector.broadcast %33 : vector<16x1xf32> to vector<16x128xf32>
    %43 = vector.broadcast %37 : vector<1x128xf32> to vector<16x128xf32>
    %44 = arith.cmpf ogt, %42, %43 : vector<16x128xf32>
    %45 = vector.broadcast %33 : vector<16x1xf32> to vector<16x128xf32>
    %46 = vector.broadcast %41 : vector<1x128xf32> to vector<16x128xf32>
    %47 = arith.cmpf ole, %45, %46 : vector<16x128xf32>
    %48 = arith.andi %44, %47 : vector<16x128xi1>
    %49 = arith.extui %48 : vector<16x128xi1> to vector<16x128xi32>
    %50 = arith.sitofp %49 : vector<16x128xi32> to vector<16x128xf32>
    %51 = tpu.iota {dimensions = array<i32: 1>} : vector<16x8xi32>
    %c0_i32_12 = arith.constant 0 : i32
    %52 = vector.broadcast %c0_i32_12 : i32 to vector<16x8xi32>
    %53 = arith.cmpi eq, %51, %52 : vector<16x8xi32>
    %c1_i32_13 = arith.constant 1 : i32
    %54 = vector.broadcast %c1_i32_13 : i32 to vector<16x8xi32>
    %55 = arith.cmpi eq, %51, %54 : vector<16x8xi32>
    %c2_i32 = arith.constant 2 : i32
    %56 = vector.broadcast %c2_i32 : i32 to vector<16x8xi32>
    %57 = arith.cmpi eq, %51, %56 : vector<16x8xi32>
    %cst_14 = arith.constant 0.000000e+00 : f32
    %58 = vector.shape_cast %33 : vector<16x1xf32> to vector<16x1xf32>
    %59 = vector.broadcast %58 : vector<16x1xf32> to vector<16x8xf32>
    %60 = vector.broadcast %cst_14 : f32 to vector<16x8xf32>
    %61 = arith.select %57, %59, %60 : vector<16x8xi1>, vector<16x8xf32>
    %62 = vector.shape_cast %23 : vector<16x1xf32> to vector<16x1xf32>
    %63 = vector.broadcast %62 : vector<16x1xf32> to vector<16x8xf32>
    %64 = arith.select %55, %63, %61 : vector<16x8xi1>, vector<16x8xf32>
    %cst_15 = arith.constant 1.000000e+00 : f32
    %65 = vector.broadcast %cst_15 : f32 to vector<16x8xf32>
    %66 = arith.select %53, %65, %64 : vector<16x8xi1>, vector<16x8xf32>
    %cst_16 = arith.constant dense<0.000000e+00> : vector<8x128xf32>
    %67 = tpu.matmul %66, %50, %cst_16 {dimension_numbers = #tpu.dot_dimension_numbers<[0], [0], [1], [1], [0, 1, 1, 1], [], []>, precision = #tpu.contract_precision<fp32>} : vector<16x8xf32>, vector<16x128xf32>, vector<8x128xf32> -> vector<8x128xf32>
    %c0_17 = arith.constant 0 : index
    %c0_18 = arith.constant 0 : index
    %c0_19 = arith.constant 0 : index
    %68 = vector.load %arg4[%c0_17, %c0_18, %c0_19] : memref<1x8x128xf32, #tpu.memory_space<vmem>>, vector<1x8x128xf32>
    %69 = vector.shape_cast %67 : vector<8x128xf32> to vector<1x8x128xf32>
    %70 = arith.addf %68, %69 : vector<1x8x128xf32>
    %c0_20 = arith.constant 0 : index
    %c0_21 = arith.constant 0 : index
    %c0_22 = arith.constant 0 : index
    %71 = vector.load %arg4[%c0_20, %c0_21, %c0_22] : memref<1x8x128xf32, #tpu.memory_space<vmem>>, vector<1x8x128xf32>
    tpu.vector_store %arg4[%c0_20, %c0_21, %c0_22], %70 {strides = array<i32>} : memref<1x8x128xf32, #tpu.memory_space<vmem>>, vector<1x8x128xf32>,
    return
  }
  func.func @transform_0(%arg0: i32, %arg1: i32) -> (i32, i32) {
    %c1_i32 = arith.constant 1 : i32
    %0 = arith.muli %arg0, %c1_i32 : i32
    %1 = arith.addi %0, %arg1 : i32
    %c0_i32 = arith.constant 0 : i32
    %2 = arith.minsi %1, %c0_i32 : i32
    %c0_i32_0 = arith.constant 0 : i32
    %c0_i32_1 = arith.constant 0 : i32
    return %2, %c0_i32_0 : i32, i32
  }
  func.func @transform_1(%arg0: i32, %arg1: i32) -> (i32, i32) {
    %c1_i32 = arith.constant 1 : i32
    %0 = arith.muli %arg0, %c1_i32 : i32
    %1 = arith.addi %0, %arg1 : i32
    %c0_i32 = arith.constant 0 : i32
    %2 = arith.minsi %1, %c0_i32 : i32
    %c0_i32_0 = arith.constant 0 : i32
    %c0_i32_1 = arith.constant 0 : i32
    return %2, %c0_i32_0 : i32, i32
  }
  func.func @transform_2(%arg0: i32, %arg1: i32) -> (i32, i32, i32) {
    %c0_i32 = arith.constant 0 : i32
    %c0_i32_0 = arith.constant 0 : i32
    %c0_i32_1 = arith.constant 0 : i32
    return %arg0, %c0_i32, %c0_i32_0 : i32, i32, i32
  }
}

</mosaic_0001>

<bundles_post_ra>
// kernel: tpu_custom_call.1
= control target key start
LH: loop header
LB: loop body
LE: loop exit
PB: predicated region body
PF: predicated region fallthrough
CT: control target
= control target key end

     0   :  { %7 = vsyncpa [#allocation3], 0  ;;  %s1374_s0 = inlined_call_operand.vmem [shape: f32[16,8], index: 0, kind: input, shape index: {}]   ;;  %s1375_s1 = inlined_call_operand.vmem [shape: s32[16,1], index: 1, kind: input, shape index: {}]   ;;  %s1376_s2 = inlined_call_operand.hbm [shape: f32[2,8,128], index: 2, kind: output, shape index: {}]  }
   0x1   :  { %9 = vsyncpa [#allocation3 + $0x1], 0  ;;  %s1205_s9 = smov 0   ;;  %s1207_s10 = smov 0  }
   0x2   :  { %s1209_s11 = smov 0   ;;  %s1211_s12 = smov 0  }
   0x3   :  { %s1213_s13 = smov 0   ;;  %s1215_s14 = smov 0  }
   0x4 LB: > { %s931_s15 = sadd.s32 4294967295, %s1182_s14   ;;  %s932_s16 = sadd.s32 4294967294, %s1182_s14   ;;  %s1182_s14 = sphi %s1215_s14, %s15_s14   ;;  %s1178_s13 = sphi %s1213_s13, %s1385_s13   ;;  %s1174_s12 = sphi %s1211_s12, %s1384_s12   ;;  %s1170_s11 = sphi %s1209_s11, %s1383_s11   ;;  %s1166_s10 = sphi %s1207_s10, %s1382_s10   ;;  %s1162_s9 = sphi %s1205_s9, %s1381_s9  }
   0x5   : > { %s27_s17 = sadd.s32 1, %s1178_s13  ;;  %s98_s18 = sadd.s32 1, %s1170_s11 }
   0x6   : > { %p29_p0 = scmp.ge.s32.totalorder %s27_s17, 2  ;;  %p108_p1 = scmp.ne.s32.totalorder %s1170_s11, %s1166_s10 }
   0x7   : > { %p109_p2 = scmp.eq.s32.totalorder %s931_s15, 1  ;;  %p114_p3 = scmp.ne.s32.totalorder %s1166_s10, %s1162_s9 }
   0x8   : > { %s1387_s17 = smov (%p29_p0, %s27_s17), 0  ;;  %p115_p5 = scmp.eq.s32.totalorder %s932_s16, 1 }
   0x9   : > { %p1245_p4 = por %p109_p2, %p108_p1  ;;  %s95_s20 = ssub.s32 %s1178_s13, %s1387_s17 }
   0xa   : > { %p935_p6 = scmp.ge.s32.totalorder %s1182_s14, 1  ;;  %p96_p7 = scmp.eq.s32.totalorder %s95_s20, 0 }
   0xb   : > { %p1252_p8 = por %p115_p5, %p114_p3  ;;  %p163_p9 = scmp.lt.s32.totalorder %s1182_s14, 3 }
   0xc   : > { %s1258_s22 = scalar_select %p96_p7, %s1170_s11, %s98_s18  }
   0xd   : > { %p164_p10 = pnand %p935_p6, %p163_p9 }
   0xe   : > { %p197_p11 = scmp.lt.s32.totalorder (!%p164_p10), %s1174_s12, 0  ;;  %vm229_vm0 = vcmask (!%p164_p10), 64512   ;;  %v252_v4 = vlaneseq (!%p164_p10)  ;;  %v1184_v32 = vmov (!%p164_p10), 0   ;;  %v1185_v33 = vmov (!%p164_p10), 0.0|0.0   ;;  %s943_s4 = sshll.u32 (!%p164_p10), %s1174_s12, 4 }
   0xf   : > { %167 = sbr.rel (%p164_p10) target bundleno = 981 (0x3d5), region = 28  ;;  %1094 = vset.pattern.permute.xlu0 (!%p164_p10), %v1184_v32  ;;  %1095 = vset.pattern.permute.xlu1 (!%p164_p10), %v1184_v32  ;;  %v1186_v47 = vmov (!%p164_p10), 0.0   ;;  %v299_v50 = vstv (!%p164_p10), %s943_s4  ;;  %s193_s5 = sand.u32 (!%p164_p10), 1, %s1166_s10  }
  0x10   : > { %v1272_v5 = vand.u32 (!%p164_p10), 127, %v252_v4  ;;  %1016 = vmatprep.subr.bf16.mxu0 (!%p164_p10), %v1185_v33  ;;  %1019 = vmatprep.subr.bf16.mxu1 (!%p164_p10), %v1185_v33  ;;  %v297_v44 = vshrl.u32 (!%p164_p10), %v252_v4, 7  ;;  %s936_s6 = sshll.u32 (!%p164_p10), %s193_s5, 3  ;;  %s953_s7 = sshll.u32 (!%p164_p10), %s1174_s12, 7 }
  0x11   : > { %s195_s8 = scalar_lea.vmem (!%p164_p10), [#allocation2], %s936_s6  ;;  %s1327_s20 = scalar_lea.hbm (!%p164_p10), %s1376_s2, %s953_s7 }
  0x12   : > { %v306_v46 = vcvt.s32.f32 (!%p164_p10), %v1272_v5  ;;  %v298_v53 = vadd.s32 (!%p164_p10), 8, %v297_v44  ;;  %v300_v54 = vadd.s32 (!%p164_p10), %v299_v50, %v297_v44  ;;  %s852_s15 = sshll.u32 (!%p164_p10), %s195_s8, 4  ;;  %s1329_s15 = int_to_ptr.vmem [resolvable:$true] %s852_s15 }
  0x14   : > { %v309_v55 = vadd.f32 (!%p164_p10), 1.0, %v306_v46  ;;  %v301_v57 = vadd.s32 (!%p164_p10), %v299_v50, %v298_v53  ;;  %vm302_vm7 = vcmp.lt.s32.totalorder (!%p164_p10), %v300_v54, 16  ;;  %v308_v58 = vmul.f32 (!%p164_p10), 0.1, %v306_v46 }
  0x16   : > { %s198_s23 = scalar_select %p197_p11, %s1174_s12, 0  ;;  %v310_v59 = vmul.f32 0.1, %v309_v55  ;;  %vm303_vm8 = vcmp.lt.s32.totalorder %v301_v57, 16 }
  0x17   : > { %s1189_s12 = smov [#allocation2]  }
  0x18   : > { %s937_s24 = sshll.u32 %s198_s23, 1  ;;  %s839_s23 = scalar_lea.sflag [#allocation3], %s193_s5 }
  0x19   : > { %p200_p12 = scmp.lt.s32.totalorder %s937_s24, 1 }
  0x1b   : > { %s1389_s24 = smov (!%p200_p12, %s937_s24), 1 }
  0x1c   : > { %s938_s25 = sshll.u32 %s1389_s24, 3  ;;  %s1104_s24 = scalar_lea.vmem %s1329_s15, 128 }
  0x1d   : > { %s203_s28 = scalar_lea.vmem %s1374_s0, %s938_s25  ;;  %s215_s3 = scalar_lea.vmem %s1375_s1, %s938_s25 }
  0x1e   : > { %v225_v0 = vld [vmem:[%s203_s28] sm:$0xff]  ;;  %v226_v1 = vld [vmem:[%s203_s28 + $0x8] sm:$0xff]  ;;  %p1105_p13 = scmp.ne.s32.totalorder %s1329_s15, %s1104_s24  ;;  %s1108_s25 = sshll.u32 %s1189_s12, 4  ;;  %s1109_s25 = int_to_ptr.vmem [resolvable:$false] %s1108_s25 }
  0x1f   : > { %v230_v2 = vsel %vm229_vm0, %v225_v0, -inf  ;;  %v233_v3 = vsel %vm229_vm0, %v226_v1, -inf  ;;  %v227_v39 = vld [vmem:[%s215_s3] sm:$0xff]  ;;  %v228_v49 = vld [vmem:[%s215_s3 + $0x8] sm:$0xff]  ;;  %s1110_s26 = scalar_lea.vmem %s1109_s25, 256  ;;  %p1111_p2 = scmp.lt.s32.totalorder %s1329_s15, %s1109_s25 }
  0x20   : > { %231 = vmax.xlane.f32.xlu0 %v230_v2  ;;  %p1106_p0 = pnand %p1105_p13, %p1245_p4  ;;  %p1112_p3 = scmp.lt.s32.totalorder %s1110_s26, %s1104_s24 }
  0x22   : > { %p1107_p1 = pneg %p1106_p0  ;;  %p1113_p5 = por %p1112_p3, %p1111_p2 }
  0x24   : > { %234 = vmax.xlane.f32.xlu0 %v233_v3  ;;  %p1114_p6 = pnand %p1113_p5, %p1107_p1 }
  0xad   : > { %v232_v6 = vpop.xlane.xlu0 %231 }
  0xae   : > { %vm254_vm1 = vcmp.eq.f32.partialorder %v225_v0, %v232_v6  ;;  %v236_v16 = vsub.f32 %v225_v0, %v232_v6  ;;  %v1187_v6 = vmov 1.0|1.0  }
  0xaf   : > { %v256_v7 = vsel %vm254_vm1, %v1272_v5, 8  ;;  %vm322_vm1 = vcmp.eq.s32.totalorder %v1272_v5, 1 }
  0xb0   : > { %v258_v8 = vsel %vm229_vm0, %v256_v7, 2147483647  ;;  %v238_v17 = vmul.f32 1.442695, %v236_v16 }
  0xb1   : > { %v235_v9 = vpop.xlane.xlu0 %234  ;;  %v260_v10 = vshra.s32 %v258_v8, 16  ;;  %v259_v20 = vand.u32 65535, %v258_v8 }
  0xb2   : > { %vm255_vm2 = vcmp.eq.f32.partialorder %v226_v1, %v235_v9  ;;  %v237_v18 = vsub.f32 %v226_v1, %v235_v9  ;;  %1096 = vpow2.f32 %v238_v17 }
  0xb3   : > { %v257_v11 = vsel %vm255_vm2, %v1272_v5, 8  ;;  %v262_v12 = vcvt.s32.f32 %v260_v10  ;;  %v261_v22 = vcvt.s32.f32 %v259_v20  ;;  %vm321_vm2 = vcmp.eq.s32.totalorder %v1272_v5, 0 }
  0xb4   : > { %v273_v13 = vsel %vm229_vm0, %v257_v11, 2147483647  ;;  %v240_v19 = vmul.f32 1.442695, %v237_v18 }
  0xb5   : > { %263 = vmin.xlane.f32.xlu1 %v262_v12  ;;  %v275_v14 = vshra.s32 %v273_v13, 16  ;;  %v274_v23 = vand.u32 65535, %v273_v13 }
  0xb6   : > { %1098 = vpow2.f32 %v240_v19 }
  0xb7   : > { %v277_v15 = vcvt.s32.f32 %v275_v14  ;;  %v276_v27 = vcvt.s32.f32 %v274_v23 }
  0xb9   : > { %278 = vmin.xlane.f32.xlu1 %v277_v15 }
  0xbc   : > { %v1097_v25 = vpop.eup %1096 }
  0xbd   : > { %v242_v28 = vsel %vm229_vm0, %v1097_v25, 0.0 }
  0xc0   : > { %v1099_v30 = vpop.eup %1098 }
  0xc1   : > { %v245_v31 = vsel %vm229_vm0, %v1099_v30, 0.0  ;;  %vm323_vm0 = vcmp.eq.s32.totalorder %v1272_v5, 2 }
 0x142   : > { %v264_v21 = vpop.xlane.xlu1 %263 }
 0x143   : > { %vm265_vm3 = vcmp.eq.f32.partialorder %v262_v12, %v264_v21  ;;  %v270_v34 = vcvt.f32.s32 %v264_v21 }
 0x144   : > { %v266_v24 = vsel %vm265_vm3, %v261_v22, inf  ;;  %vm1188_vm3 = vmmov 0  }
 0x145   : > { %267 = vmin.xlane.f32.xlu0 %v266_v24  ;;  %v271_v37 = vshll.u32 %v270_v34, 16  ;;  %985 = vmatprep.mubr.msk.f32.mxu1 %vm1188_vm3, %v1186_v47 }
 0x146   : > { %v279_v26 = vpop.xlane.xlu1 %278  ;;  %978 = vmatprep.mubr.msk.f32.mxu0 %vm1188_vm3, %v1186_v47 }
 0x147   : > { %vm280_vm4 = vcmp.eq.f32.partialorder %v277_v15, %v279_v26  ;;  %v285_v35 = vcvt.f32.s32 %v279_v26 }
 0x148   : > { %v281_v29 = vsel %vm280_vm4, %v276_v27, inf  ;;  %vm372_vm4 = vcmask 130048  }
 0x149   : > { %243 = vadd.xlane.f32.xlu0 %v242_v28  ;;  %282 = vmin.xlane.f32.xlu1 %v281_v29  ;;  %v286_v41 = vshll.u32 %v285_v35, 16 }
 0x14d   : > { %246 = vadd.xlane.f32.xlu1 %v245_v31 }
 0x1d2   : > { %v268_v36 = vpop.xlane.xlu0 %267 }
 0x1d3   : > { %v269_v38 = vcvt.f32.s32 %v268_v36 }
 0x1d5   : > { %v272_v40 = vadd.s32 %v271_v37, %v269_v38 }
 0x1d6   : > { %v283_v42 = vpop.xlane.xlu1 %282  ;;  %v244_v43 = vpop.xlane.xlu0 %243 }
 0x1d7   : > { %v284_v45 = vcvt.f32.s32 %v283_v42  ;;  %1100 = vrcp.f32 %v244_v43  ;;  %vm288_vm5 = vcmp.eq.s32.totalorder %v272_v40, %v227_v39 }
 0x1d8   : > { %v941_v48 = vsel %vm288_vm5, 1.0, %v1186_v47 }
 0x1d9   : > { %v287_v51 = vadd.s32 %v286_v41, %v284_v45  ;;  %328 = vperm.xlu0 %1094, %v941_v48  }
 0x1da   : > { %v247_v52 = vpop.xlane.xlu1 %246 }
 0x1db   : > { %1102 = vrcp.f32 %v247_v52  ;;  %vm289_vm6 = vcmp.eq.s32.totalorder %v287_v51, %v228_v49 }
 0x1dc   : > { %v942_v56 = vsel %vm289_vm6, 1.0, %v1186_v47 }
 0x1dd   : > { %333 = vperm.xlu1 %1095, %v942_v56  }
 0x1e1   : > { %v1101_v60 = vpop.eup %1100 }
 0x1e2   : > { %v304_v61 = vsel %vm302_vm7, %v1101_v60, -1.0 }
 0x1e3   : > { %vm311_vm9 = vcmp.gt.f32.partialorder %v304_v61, %v308_v58  ;;  %vm313_vm10 = vcmp.le.f32.partialorder %v304_v61, %v310_v59  ;;  %v324_v16 = vsel %vm323_vm0, %v304_v61, 0.0 }
 0x1e4   : > { %vm315_vm11 = vmand %vm311_vm9, %vm313_vm10 }
 0x1e5   : > { %v1103_v62 = vpop.eup %1102  ;;  %v944_v63 = vsel %vm315_vm11, 1.0, %v1186_v47 }
 0x1e6   : > { %v305_v0 = vsel %vm303_vm8, %v1103_v62, -1.0  ;;  %v455_v1 = vsub.f32 %v944_v63, %v944_v63 }
 0x1e7   : > { %vm312_vm12 = vcmp.gt.f32.partialorder %v305_v0, %v308_v58  ;;  %vm314_vm13 = vcmp.le.f32.partialorder %v305_v0, %v310_v59  ;;  %v325_v20 = vsel %vm323_vm0, %v305_v0, 0.0 }
 0x1e8   : > { %vm316_vm14 = vmand %vm312_vm12, %vm314_vm13  ;;  %v456_v2 = vand.u32 4294901760, %v455_v1 }
 0x1e9   : > { %v945_v3 = vsel %vm316_vm14, 1.0, %v1186_v47  ;;  %vm1293_vm15 = vmpackc.low %vm316_vm14, %vm315_vm11 }
 0x1ea   : > { %1018 = vmatpush3.bf16.msk.msra.mxu0 %vm1293_vm15, %v1187_v6  ;;  %v462_v7 = vsub.f32 %v945_v3, %v945_v3  ;;  %v457_v8 = vsub.f32 %v455_v1, %v456_v2 }
 0x1eb   : > { %1022 = vmatprep.subr.bf16.mxu0 %v1185_v33 }
 0x1ec   : > { %v463_v9 = vand.u32 4294901760, %v462_v7  ;;  %v1023_v10 = vpack.c.bf16 %v462_v7, %v455_v1  ;;  %v458_v13 = vand.u32 4294901760, %v457_v8 }
 0x1ee   : > { %v464_v11 = vsub.f32 %v462_v7, %v463_v9  ;;  %v1029_v12 = vpack.c.bf16 %v463_v9, %v456_v2 }
 0x1f0   : > { %v465_v14 = vand.u32 4294901760, %v464_v11 }
 0x1f2   : > { %v1020_v15 = vpack.c.bf16 %v465_v14, %v458_v13 }
 0x1f4   : > { %1021 = vmatpush3.bf16.msra.mxu1 %v1020_v15 }
 0x1f5   : > { %1025 = vmatprep.subr.bf16.mxu1 %v1185_v33 }
 0x258   : > { %v329_v17 = vpop.permute.xlu0 %328 }
 0x259   : > { %v336_v18 = vsel %vm322_vm1, %v329_v17, %v324_v16 }
 0x25a   : > { %v338_v19 = vsel %vm321_vm2, 1.0, %v336_v18 }
 0x25b   : > { %340 = vxpose.xlu1.b32.start [1/2] (short) (narrow) %v338_v19, 8 }
 0x25c   : > { %v334_v21 = vpop.permute.xlu1 %333 }
 0x25d   : > { %v337_v22 = vsel %vm322_vm1, %v334_v21, %v325_v20 }
 0x25e   : > { %v339_v23 = vsel %vm321_vm2, 1.0, %v337_v22 }
 0x25f   : > { %341 = vxpose.xlu1.b32.end [2/2] (short) (narrow) %v339_v23, 8 }
 0x2db   : > { %v356_v24 = vpop.trf.xlu1 }
 0x2dc   : > { %v374_v5 = vsel %vm372_vm4, %v356_v24, 0 }
 0x2dd   : > { %v443_v25 = vand.u32 4294901760, %v374_v5 }
 0x2df   : > { %v444_v26 = vsub.f32 %v374_v5, %v443_v25  ;;  %986 = vmatmul.mubr.f32.vlgmr.msra.gmra.mrb[0].mxu1 %v443_v25 }
 0x2e0   : > { %1027 = vmatpush3.bf16.msk.msra.mxu1 %vm1293_vm15, %v1187_v6  ;;  %999 = vmatprep.mubr.msk.f32.mxu1 %vm1188_vm3, %v1186_v47 }
 0x2e1   : > { %v445_v27 = vand.u32 4294901760, %v444_v26  ;;  %1031 = vmatprep.subr.bf16.mxu1 %v1185_v33 }
 0x2e3   : > { %1000 = vmatmul.mubr.f32.vlgmr.msra.gmra.mrb[2].mxu1 %v445_v27  ;;  %v446_v28 = vsub.f32 %v444_v26, %v445_v27 }
 0x2e4   : > { %1033 = vmatpush3.bf16.msk.msra.mxu1 %vm1293_vm15, %v1187_v6  ;;  %1013 = vmatprep.mubr.msk.f32.mxu1 %vm1188_vm3, %v1186_v47 }
 0x2e5   : > { %v447_v29 = vand.u32 4294901760, %v446_v28 }
 0x2e7   : > { %979 = vmatmul.mubr.f32.vlgmr.msra.gmra.mrb[0].mxu0 %v447_v29  ;;  %1014 = vmatmul.mubr.f32.vlgmr.msra.gmra.mrb[4].mxu1 %v443_v25 }
 0x2e8   : > { %1024 = vmatpush3.bf16.msra.mxu0 %v1023_v10  ;;  %992 = vmatprep.mubr.msk.f32.mxu0 %vm1188_vm3, %v1186_v47 }
 0x2e9   : > { %1028 = vmatprep.subr.bf16.mxu0 %v1185_v33 }
 0x2eb   : > { %993 = vmatmul.mubr.f32.vlgmr.msra.gmra.mrb[2].mxu0 %v444_v26 }
 0x2ec   : > { %1030 = vmatpush3.bf16.msra.mxu0 %v1029_v12  ;;  %1006 = vmatprep.mubr.msk.f32.mxu0 %vm1188_vm3, %v1186_v47 }
 0x2ef   : > { %1007 = vmatmul.mubr.f32.vlgmr.msra.gmra.mrb[4].mxu0 %v443_v25 }
 0x3b2   : > { %v530_v30 = vpop.f32.mrb[0].mxu1 }
 0x3b3   : > { %v987_v31 = vpop.f32.mrb[1].mxu1 }
 0x3b6   : > { %v681_v32 = vpop.f32.mrb[2].mxu1 }
 0x3b7   : > { %v1001_v34 = vpop.f32.mrb[3].mxu1 }
 0x3ba   : > { %v449_v35 = vpop.f32.mrb[0].mxu0  ;;  %v831_v36 = vpop.f32.mrb[4].mxu1 }
 0x3bb   : > { %v531_v37 = vadd.f32 %v530_v30, %v449_v35  ;;  %v980_v38 = vpop.f32.mrb[1].mxu0  ;;  %v1015_v39 = vpop.f32.mrb[5].mxu1 }
 0x3be   : > { %v606_v40 = vpop.f32.mrb[2].mxu0 }
 0x3bf   : > { %v607_v33 = vadd.f32 %v606_v40, %v531_v37  ;;  %v994_v41 = vpop.f32.mrb[3].mxu0 }
 0x3c1   : > { %v682_v42 = vadd.f32 %v681_v32, %v607_v33 }
 0x3c2   : > { %v758_v43 = vpop.f32.mrb[4].mxu0 }
 0x3c3   : > { %v759_v44 = vadd.f32 %v758_v43, %v682_v42  ;;  %v1008_v45 = vpop.f32.mrb[5].mxu0 }
 0x3c5   : > { %v832_v46 = vadd.f32 %v831_v36, %v759_v44 }
 0x3c7   : > { %837 = vst [vmem:[%s195_s8] sm:$0xff] %v832_v46 }
 0x3c8   : > { %1117 = shalt.err (!%p1114_p6)
}
 0x3c9   : > { %s1118_s27 = scalar_lea.hbm %s1327_s20, 128  ;;  %s1122_s30 = scalar_lea.hbm %s1376_s2, 256 }
 0x3ca   : > { %p1119_p7 = scmp.ne.s32.totalorder %s1327_s20, %s1118_s27  ;;  %p1123_p11 = scmp.lt.u32.totalorder %s1327_s20, %s1376_s2 }
 0x3cb   : > { %p1124_p12 = scmp.lt.u32.totalorder %s1122_s30, %s1118_s27  ;;  %p1126_p0 = scmp.lt.u32.totalorder %s1118_s27, %s1327_s20 }
 0x3cc   : > { %p1120_p9 = pnand %p1119_p7, %p1245_p4 }
 0x3cd   : > { %p1125_p13 = por %p1124_p12, %p1123_p11 }
 0x3ce   : > { %p1121_p10 = pneg %p1120_p9 }
 0x3cf   : > { %p1127_p1 = por %p1126_p0, %p1125_p13 }
 0x3d1   : > { %p1128_p2 = pnand %p1127_p1, %p1121_p10 }
 0x3d3   : > { %1131 = shalt.err (!%p1128_p2)
}
 0x3d4   : > { %1034 = dma.vmem_to_hbm [thread:$0]  (%p1245_p4), %s1329_s15, 128, %s1327_s20, %s839_s23  }
 0x3d5 PF: > { %p1040_p3 = scmp.ge.s32.totalorder %s1182_s14, 2  ;;  %s864_s5 = sand.u32 1, %s1162_s9  }
 0x3d6   : > { %s865_s6 = scalar_lea.sflag [#allocation3], %s864_s5 }
 0x3d7   : > { %p1037_p5 = pnand %p1040_p3, %p1252_p8 }
 0x3d9   : > { %1157 = dma.done.wait (!%p1037_p5), %s865_s6, 128  }
 0x3da   : > { %1159 = vsyncadd (!%p1037_p5), %s865_s6, 4294967168  ;;  %s15_s14 = sadd.s32 1, %s1182_s14   ;;  %s1381_s9 = smov %s1166_s10 }
 0x3db   : > { %p12_p6 = scmp.ge.s32.totalorder %s15_s14, 4   ;;  %s1382_s10 = smov %s1170_s11 }
 0x3dc   : > { %s1383_s11 = smov %s1258_s22  ;;  %s1384_s12 = smov %s1178_s13 }
 0x3dd   : > { %s1385_s13 = smov %s1387_s17  ;;  %14 = sbr.rel (!%p12_p6) target bundleno = 4 (0x4), region = 70 }
 0x3e4   :  { %870 = vsyncpa [#allocation3], 1 }
 0x3e5   :  { %872 = vsyncpa [#allocation3 + $0x1], 1 }

</bundles_post_ra>
